<compile_context>
chip_gen: v7x
topology: tpu7x:2x2x1
jax: 0.10.0
libtpu: 0.0.40
codegen_flags: <defaults>
</compile_context>

<pallas_src>
import functools

import jax
import jax.numpy as jnp
from jax import lax
from jax.experimental import pallas as pl
from jax.experimental.pallas import tpu as pltpu

_LANE = 128
_SUBLANE = 8


def _round_up(x, m):
    return (x + m - 1) // m * m


def _vmem_capacity_bytes():
    try:
        return int(pltpu.get_tpu_info().vmem_capacity_bytes)
    except Exception:
        return 64 * 1024 * 1024  # conservative: v7x per-TC physical VMEM


# --------------------------------------------------------------------------
# Fast path: VMEM-resident tables, TB-row batched gather per grid step.
# --------------------------------------------------------------------------
def _resident_gather_kernel(n_ent, n_rel, tb,
                            h_ref, r_ref, t_ref,        # SMEM scalar prefetch
                            ent_ref, rel_ref,            # VMEM-resident tables
                            head_out, rel_out, tail_out):
    base = pl.program_id(0) * tb

    def body(j, carry):
        # Indices live in SMEM (scalar prefetch); clamp in-kernel (scalar ops)
        # so a bad id can never address outside the resident table.
        h = jnp.clip(h_ref[base + j], 0, n_ent - 1)
        r = jnp.clip(r_ref[base + j], 0, n_rel - 1)
        t = jnp.clip(t_ref[base + j], 0, n_ent - 1)
        head_out[pl.ds(j, 1), :] = ent_ref[pl.ds(h, 1), :]
        rel_out[pl.ds(j, 1), :] = rel_ref[pl.ds(r, 1), :]
        tail_out[pl.ds(j, 1), :] = ent_ref[pl.ds(t, 1), :]
        return carry

    lax.fori_loop(0, tb, body, 0)


def _resident_forward(entity_table, rel_table, h_i, r_i, t_i, tb, vmem_limit):
    n_ent, dp = entity_table.shape
    n_rel = rel_table.shape[0]
    b_pad = h_i.shape[0]
    n_tiles = b_pad // tb

    kernel = functools.partial(_resident_gather_kernel, n_ent, n_rel, tb)

    grid_spec = pltpu.PrefetchScalarGridSpec(
        num_scalar_prefetch=3,
        grid=(n_tiles,),
        in_specs=[
            # Full-array blocks with a constant index_map: the tables are DMA'd
            # once and stay resident across all grid steps.
            pl.BlockSpec((n_ent, dp), lambda i, h, r, t: (0, 0)),
            pl.BlockSpec((n_rel, dp), lambda i, h, r, t: (0, 0)),
        ],
        out_specs=[
            pl.BlockSpec((tb, dp), lambda i, h, r, t: (i, 0)),
            pl.BlockSpec((tb, dp), lambda i, h, r, t: (i, 0)),
            pl.BlockSpec((tb, dp), lambda i, h, r, t: (i, 0)),
        ],
    )
    out_shape = (
        jax.ShapeDtypeStruct((b_pad, dp), entity_table.dtype),
        jax.ShapeDtypeStruct((b_pad, dp), rel_table.dtype),
        jax.ShapeDtypeStruct((b_pad, dp), entity_table.dtype),
    )
    return pl.pallas_call(
        kernel,
        out_shape=out_shape,
        grid_spec=grid_spec,
        compiler_params=pltpu.CompilerParams(
            dimension_semantics=("parallel",),
            vmem_limit_bytes=int(vmem_limit)),
    )(h_i, r_i, t_i, entity_table, rel_table)


# --------------------------------------------------------------------------
# Fallback: tables too large for VMEM.  Per-row BlockSpec DMA gather, but the
# (TB, dp) output block stays resident across the inner axis so each (8,128)
# output tile is written back exactly once.
# --------------------------------------------------------------------------
def _streamed_gather_kernel(h_ref, r_ref, t_ref,
                            head_row, rel_row, tail_row,
                            head_out, rel_out, tail_out):
    del h_ref, r_ref, t_ref  # consumed by the index_maps
    j = pl.program_id(1)
    head_out[pl.ds(j, 1), :] = head_row[...]
    rel_out[pl.ds(j, 1), :] = rel_row[...]
    tail_out[pl.ds(j, 1), :] = tail_row[...]


def _streamed_forward(entity_table, rel_table, h_i, r_i, t_i, tb):
    n_ent, dp = entity_table.shape
    n_rel = rel_table.shape[0]
    b_pad = h_i.shape[0]
    n_tiles = b_pad // tb

    # On this path the indices drive HBM DMAs directly -> clamp in the wrapper.
    h_i = jnp.clip(h_i, 0, n_ent - 1)
    t_i = jnp.clip(t_i, 0, n_ent - 1)
    r_i = jnp.clip(r_i, 0, n_rel - 1)

    grid_spec = pltpu.PrefetchScalarGridSpec(
        num_scalar_prefetch=3,
        grid=(n_tiles, tb),
        in_specs=[
            pl.BlockSpec((1, dp), lambda i, j, h, r, t: (h[i * tb + j], 0),
                         pipeline_mode=pl.Buffered(4)),
            pl.BlockSpec((1, dp), lambda i, j, h, r, t: (r[i * tb + j], 0),
                         pipeline_mode=pl.Buffered(4)),
            pl.BlockSpec((1, dp), lambda i, j, h, r, t: (t[i * tb + j], 0),
                         pipeline_mode=pl.Buffered(4)),
        ],
        out_specs=[
            pl.BlockSpec((tb, dp), lambda i, j, h, r, t: (i, 0)),
            pl.BlockSpec((tb, dp), lambda i, j, h, r, t: (i, 0)),
            pl.BlockSpec((tb, dp), lambda i, j, h, r, t: (i, 0)),
        ],
    )
    out_shape = (
        jax.ShapeDtypeStruct((b_pad, dp), entity_table.dtype),
        jax.ShapeDtypeStruct((b_pad, dp), rel_table.dtype),
        jax.ShapeDtypeStruct((b_pad, dp), entity_table.dtype),
    )
    return pl.pallas_call(
        _streamed_gather_kernel,
        out_shape=out_shape,
        grid_spec=grid_spec,
        compiler_params=pltpu.CompilerParams(
            dimension_semantics=("parallel", "arbitrary")),
    )(h_i, r_i, t_i, entity_table, rel_table, entity_table)


# --------------------------------------------------------------------------
# Dispatcher.
# --------------------------------------------------------------------------
def rgcn_encoder_forward(entity_table, rel_table, head, rel, tail, *,
                         tile_rows=None, vmem_fraction=0.75):
    """Fused (head, rel, tail) embedding gather.

    entity_table: (num_entities, Dp) float32, Dp a multiple of 128
    rel_table:    (num_rels,    Dp) float32
    head/rel/tail: (B,) integer index vectors
    Returns three (B, Dp) float32 arrays.
    """
    n_ent, dp = entity_table.shape
    n_rel, dp_rel = rel_table.shape
    assert dp == dp_rel and dp % _LANE == 0
    b = head.shape[0]

    if tile_rows is None:
        tile_rows = 256 if b >= 256 else max(_SUBLANE, _round_up(b, _SUBLANE))
    tb = int(tile_rows)
    assert tb % _SUBLANE == 0
    b_pad = _round_up(b, tb)

    def prep(x):
        x = x.astype(jnp.int32).reshape(-1)
        if x.shape[0] != b_pad:
            x = jnp.pad(x, (0, b_pad - x.shape[0]))
        return x

    h_i, r_i, t_i = prep(head), prep(rel), prep(tail)

    # Per-generation VMEM budget for the resident-table fast path
    # (v5e/v6e: 128 MiB physical, v7x: 64 MiB per TensorCore).
    itemsize = jnp.dtype(entity_table.dtype).itemsize
    table_bytes = (n_ent + n_rel) * dp * itemsize * 2     # pipeline buffering
    out_bytes = 3 * tb * dp * itemsize * 2                # double-buffered outs
    need = table_bytes + out_bytes + 2 * 1024 * 1024      # slack
    budget = int(vmem_fraction * _vmem_capacity_bytes())

    if need <= budget:
        vmem_limit = min(budget, max(need, 32 * 1024 * 1024))
        outs = _resident_forward(entity_table, rel_table, h_i, r_i, t_i,
                                 tb, vmem_limit)
    else:
        outs = _streamed_forward(entity_table, rel_table, h_i, r_i, t_i, tb)

    if b_pad != b:
        outs = tuple(o[:b] for o in outs)
    return outs


class RGCNEncoderPallas:
    """JAX/Pallas port of the PyTorch RGCNEncoder (forward pass only)."""

    def __init__(self, num_entities, num_rels, embedding_dim=100, key=None,
                 return_padded=False):
        if key is None:
            key = jax.random.PRNGKey(0)
        k_ent, k_rel, k_fc_w, k_fc_b = jax.random.split(key, 4)

        self.embedding_dim = embedding_dim
        self.return_padded = return_padded
        self._dp = _round_up(embedding_dim, _LANE)
        pad = self._dp - embedding_dim

        # nn.Embedding default init: N(0, 1).  Feature dim is stored padded to
        # a lane-dense multiple of 128; padded columns are zero.
        ent = jax.random.normal(
            k_ent, (num_entities, embedding_dim), dtype=jnp.float32)
        relt = jax.random.normal(
            k_rel, (num_rels, embedding_dim), dtype=jnp.float32)
        self.entity_embedding = jnp.pad(ent, ((0, 0), (0, pad)))
        self.rel_embedding = jnp.pad(relt, ((0, 0), (0, pad)))

        # fc / dropout exist in __init__ but are unused in forward; init only.
        bound = 1.0 / (embedding_dim ** 0.5)
        self.fc_w = jax.random.uniform(
            k_fc_w, (embedding_dim, embedding_dim),
            minval=-bound, maxval=bound, dtype=jnp.float32)
        self.fc_b = jax.random.uniform(
            k_fc_b, (embedding_dim,),
            minval=-bound, maxval=bound, dtype=jnp.float32)

    def __call__(self, head, rel, tail, *, tile_rows=None):
        head_emb, rel_emb, tail_emb = rgcn_encoder_forward(
            self.entity_embedding, self.rel_embedding, head, rel, tail,
            tile_rows=tile_rows)
        if self._dp == self.embedding_dim or self.return_padded:
            # Lane-dense outputs; no slice copies (preferred — keep the
            # downstream consumer on 128-wide layout).
            return head_emb, rel_emb, tail_emb
        d = self.embedding_dim
        return head_emb[:, :d], rel_emb[:, :d], tail_emb[:, :d]


if __name__ == "__main__":
    num_entities = 64
    num_rels = 16
    embedding_dim = 128   # lane-dense (multiple of 128) -> no output slicing
    batch = 32            # number of (head, rel, tail) triples

    root = jax.random.PRNGKey(0)
    k_model, k_h, k_r, k_t = jax.random.split(root, 4)

    model = RGCNEncoderPallas(num_entities, num_rels, embedding_dim,
                              key=k_model)

    head = jax.random.randint(k_h, (batch,), 0, num_entities, dtype=jnp.int32)
    rel = jax.random.randint(k_r, (batch,), 0, num_rels, dtype=jnp.int32)
    tail = jax.random.randint(k_t, (batch,), 0, num_entities, dtype=jnp.int32)

    # Plain-JAX reference.
    ref_head = jnp.take(model.entity_embedding, head, axis=0)
    ref_rel = jnp.take(model.rel_embedding, rel, axis=0)
    ref_tail = jnp.take(model.entity_embedding, tail, axis=0)

    # 1) Default tiling (single (batch,128) tile).
    head_emb, rel_emb, tail_emb = model(head, rel, tail)
    jax.block_until_ready((head_emb, rel_emb, tail_emb))
    assert head_emb.shape == (batch, embedding_dim)
    assert rel_emb.shape == (batch, embedding_dim)
    assert tail_emb.shape == (batch, embedding_dim)
    assert jnp.allclose(head_emb, ref_head, atol=1e-6)
    assert jnp.allclose(rel_emb, ref_rel, atol=1e-6)
    assert jnp.allclose(tail_emb, ref_tail, atol=1e-6)

    # 2) Multi-tile grid (4 tiles of 8 rows) to exercise the batched grid path.
    head_emb2, rel_emb2, tail_emb2 = model(head, rel, tail, tile_rows=8)
    jax.block_until_ready((head_emb2, rel_emb2, tail_emb2))
    assert jnp.allclose(head_emb2, ref_head, atol=1e-6)
    assert jnp.allclose(rel_emb2, ref_rel, atol=1e-6)
    assert jnp.allclose(tail_emb2, ref_tail, atol=1e-6)

    print("KERNEL_OK")
</pallas_src>

<mosaic_0001>
module attributes {stable_mosaic.version = 11 : i64} {
  func.func @_resident_gather_kernel(%arg0: i32, %arg1: memref<32xi32, #tpu.memory_space<smem>>, %arg2: memref<32xi32, #tpu.memory_space<smem>>, %arg3: memref<32xi32, #tpu.memory_space<smem>>, %arg4: memref<64x128xf32, #tpu.memory_space<vmem>>, %arg5: memref<16x128xf32, #tpu.memory_space<vmem>>, %arg6: memref<32x128xf32, #tpu.memory_space<vmem>>, %arg7: memref<32x128xf32, #tpu.memory_space<vmem>>, %arg8: memref<32x128xf32, #tpu.memory_space<vmem>>) attributes {dimension_semantics = [#tpu.dimension_semantics<parallel>], iteration_bounds = array<i64: 1>, scalar_prefetch = 3 : i64, scratch_operands = 0 : i64, tpu.core_type = #tpu.core_type<tc>, window_params = [{pipeline_mode = #tpu.pipeline_mode<synchronous>, transform_indices = @transform_0, window_bounds = array<i64: 64, 128>}, {pipeline_mode = #tpu.pipeline_mode<synchronous>, transform_indices = @transform_1, window_bounds = array<i64: 16, 128>}, {transform_indices = @transform_2, window_bounds = array<i64: 32, 128>}, {transform_indices = @transform_3, window_bounds = array<i64: 32, 128>}, {transform_indices = @transform_4, window_bounds = array<i64: 32, 128>}]} {
    %c32_i32 = arith.constant 32 : i32
    %0 = arith.muli %arg0, %c32_i32 : i32
    %c0_i32 = arith.constant 0 : i32
    %c32_i32_0 = arith.constant 32 : i32
    %1 = arith.addi %c0_i32, %c32_i32_0 : i32
    %c1_i32 = arith.constant 1 : i32
    scf.for %arg9 = %c0_i32 to %1 step %c1_i32  : i32 {
      %2 = arith.addi %0, %arg9 : i32
      %3 = arith.index_cast %2 : i32 to index
      %4 = memref.load %arg1[%3] : memref<32xi32, #tpu.memory_space<smem>>
      %c0_i32_2 = arith.constant 0 : i32
      %c63_i32 = arith.constant 63 : i32
      %5 = arith.maxsi %c0_i32_2, %4 : i32
      %6 = arith.minsi %c63_i32, %5 : i32
      %7 = arith.addi %0, %arg9 : i32
      %8 = arith.index_cast %7 : i32 to index
      %9 = memref.load %arg2[%8] : memref<32xi32, #tpu.memory_space<smem>>
      %c0_i32_3 = arith.constant 0 : i32
      %c15_i32 = arith.constant 15 : i32
      %10 = arith.maxsi %c0_i32_3, %9 : i32
      %11 = arith.minsi %c15_i32, %10 : i32
      %12 = arith.addi %0, %arg9 : i32
      %13 = arith.index_cast %12 : i32 to index
      %14 = memref.load %arg3[%13] : memref<32xi32, #tpu.memory_space<smem>>
      %c0_i32_4 = arith.constant 0 : i32
      %c63_i32_5 = arith.constant 63 : i32
      %15 = arith.maxsi %c0_i32_4, %14 : i32
      %16 = arith.minsi %c63_i32_5, %15 : i32
      %17 = arith.index_cast %6 : i32 to index
      %c0 = arith.constant 0 : index
      %18 = vector.load %arg4[%17, %c0] : memref<64x128xf32, #tpu.memory_space<vmem>>, vector<1x128xf32>
      %19 = arith.index_cast %arg9 : i32 to index
      %c0_6 = arith.constant 0 : index
      %20 = vector.load %arg6[%19, %c0_6] : memref<32x128xf32, #tpu.memory_space<vmem>>, vector<1x128xf32>
      tpu.vector_store %arg6[%19, %c0_6], %18 {strides = array<i32>} : memref<32x128xf32, #tpu.memory_space<vmem>>, vector<1x128xf32>,
      %21 = arith.index_cast %11 : i32 to index
      %c0_7 = arith.constant 0 : index
      %22 = vector.load %arg5[%21, %c0_7] : memref<16x128xf32, #tpu.memory_space<vmem>>, vector<1x128xf32>
      %23 = arith.index_cast %arg9 : i32 to index
      %c0_8 = arith.constant 0 : index
      %24 = vector.load %arg7[%23, %c0_8] : memref<32x128xf32, #tpu.memory_space<vmem>>, vector<1x128xf32>
      tpu.vector_store %arg7[%23, %c0_8], %22 {strides = array<i32>} : memref<32x128xf32, #tpu.memory_space<vmem>>, vector<1x128xf32>,
      %25 = arith.index_cast %16 : i32 to index
      %c0_9 = arith.constant 0 : index
      %26 = vector.load %arg4[%25, %c0_9] : memref<64x128xf32, #tpu.memory_space<vmem>>, vector<1x128xf32>
      %27 = arith.index_cast %arg9 : i32 to index
      %c0_10 = arith.constant 0 : index
      %28 = vector.load %arg8[%27, %c0_10] : memref<32x128xf32, #tpu.memory_space<vmem>>, vector<1x128xf32>
      tpu.vector_store %arg8[%27, %c0_10], %26 {strides = array<i32>} : memref<32x128xf32, #tpu.memory_space<vmem>>, vector<1x128xf32>,
    }
    %c32_i32_1 = arith.constant 32 : i32
    return
  }
  func.func @transform_0(%arg0: i32, %arg1: memref<32xi32, #tpu.memory_space<smem>>, %arg2: memref<32xi32, #tpu.memory_space<smem>>, %arg3: memref<32xi32, #tpu.memory_space<smem>>) -> (i32, i32) {
    %c0_i32 = arith.constant 0 : i32
    %c0_i32_0 = arith.constant 0 : i32
    %c0_i32_1 = arith.constant 0 : i32
    return %c0_i32, %c0_i32_0 : i32, i32
  }
  func.func @transform_1(%arg0: i32, %arg1: memref<32xi32, #tpu.memory_space<smem>>, %arg2: memref<32xi32, #tpu.memory_space<smem>>, %arg3: memref<32xi32, #tpu.memory_space<smem>>) -> (i32, i32) {
    %c0_i32 = arith.constant 0 : i32
    %c0_i32_0 = arith.constant 0 : i32
    %c0_i32_1 = arith.constant 0 : i32
    return %c0_i32, %c0_i32_0 : i32, i32
  }
  func.func @transform_2(%arg0: i32, %arg1: memref<32xi32, #tpu.memory_space<smem>>, %arg2: memref<32xi32, #tpu.memory_space<smem>>, %arg3: memref<32xi32, #tpu.memory_space<smem>>) -> (i32, i32) {
    %c0_i32 = arith.constant 0 : i32
    %c0_i32_0 = arith.constant 0 : i32
    return %arg0, %c0_i32 : i32, i32
  }
  func.func @transform_3(%arg0: i32, %arg1: memref<32xi32, #tpu.memory_space<smem>>, %arg2: memref<32xi32, #tpu.memory_space<smem>>, %arg3: memref<32xi32, #tpu.memory_space<smem>>) -> (i32, i32) {
    %c0_i32 = arith.constant 0 : i32
    %c0_i32_0 = arith.constant 0 : i32
    return %arg0, %c0_i32 : i32, i32
  }
  func.func @transform_4(%arg0: i32, %arg1: memref<32xi32, #tpu.memory_space<smem>>, %arg2: memref<32xi32, #tpu.memory_space<smem>>, %arg3: memref<32xi32, #tpu.memory_space<smem>>) -> (i32, i32) {
    %c0_i32 = arith.constant 0 : i32
    %c0_i32_0 = arith.constant 0 : i32
    return %arg0, %c0_i32 : i32, i32
  }
}

</mosaic_0001>

<bundles_post_ra>
// kernel: tpu_custom_call.1
= control target key start
LH: loop header
LB: loop body
LE: loop exit
PB: predicated region body
PF: predicated region fallthrough
CT: control target
= control target key end

     0   :  { %s519_s0 = inlined_call_operand.hbm [shape: s32[32], index: 0, kind: input, shape index: {}]   ;;  %s520_s3 = inlined_call_operand.hbm [shape: f32[64,128], index: 3, kind: input, shape index: {}]   ;;  %s521_s4 = inlined_call_operand.hbm [shape: f32[16,128], index: 4, kind: input, shape index: {}]   ;;  %s522_s5 = inlined_call_operand.hbm [shape: f32[32,128], index: 5, kind: output, shape index: {0}]   ;;  %s523_s6 = inlined_call_operand.hbm [shape: f32[32,128], index: 6, kind: output, shape index: {1}]   ;;  %s524_s7 = inlined_call_operand.hbm [shape: f32[32,128], index: 7, kind: output, shape index: {2}]   ;;  %s525_s1 = inlined_call_operand.vmem [shape: s32[32], index: 1, kind: input, shape index: {}]   ;;  %s526_s2 = inlined_call_operand.vmem [shape: s32[32], index: 2, kind: input, shape index: {}]  }
   0x1   :  { %s193_s26 = scalar_lea.hbm %s519_s0, 16 }
   0x2   :  { %p194_p0 = scmp.ne.s32.totalorder %s519_s0, %s193_s26  ;;  %p197_p1 = scmp.lt.u32.totalorder %s193_s26, %s519_s0 }
   0x4   :  { %p199_p2 = pnand %p197_p1, %p194_p0 }
   0x6   :  { %202 = shalt.err (!%p199_p2)  }
   0x7   :  { %s355_s8 = smov [#allocation3]   ;;  %s15_s13 = sshll.u32 %s525_s1, 4  ;;  %s16_s13 = int_to_ptr.vmem [resolvable:$true] %s15_s13 }
   0x8   :  { %14 = dma.hbm_to_smem %s519_s0, 16, %s355_s8, [#allocation2] }
   0x9   :  { %s19_s16 = sshll.u32 %s526_s2, 4  ;;  %s203_s17 = scalar_lea.vmem %s16_s13, 16  ;;  %s20_s16 = int_to_ptr.vmem [resolvable:$true] %s19_s16 }
   0xa   :  { %p204_p3 = scmp.ne.s32.totalorder %s16_s13, %s203_s17  ;;  %p208_p4 = scmp.lt.s32.totalorder %s16_s13, %s16_s13 }
   0xb   :  { %p209_p5 = scmp.lt.s32.totalorder %s203_s17, %s203_s17 }
   0xd   :  { %p210_p6 = por %p209_p5, %p208_p4 }
   0xf   :  { %p211_p7 = pnand %p210_p6, %p204_p3 }
  0x11   :  { %214 = shalt.err (!%p211_p7)  }
  0x12   :  { %s356_s18 = smov [#allocation4]   ;;  %s215_s0 = scalar_lea.vmem %s20_s16, 16 }
  0x13   :  { %18 = dma.vmem_to_smem %s16_s13, 16, %s356_s18, [#allocation2] }
  0x14   :  { %p216_p8 = scmp.ne.s32.totalorder %s20_s16, %s215_s0  ;;  %p220_p9 = scmp.lt.s32.totalorder %s20_s16, %s20_s16 }
  0x15   :  { %p221_p10 = scmp.lt.s32.totalorder %s215_s0, %s215_s0 }
  0x17   :  { %p222_p11 = por %p221_p10, %p220_p9 }
  0x19   :  { %p223_p12 = pnand %p222_p11, %p216_p8 }
  0x1b   :  { %226 = shalt.err (!%p223_p12)  }
  0x1c   :  { %s357_s1 = smov [#allocation5]  }
  0x1d   :  { %22 = dma.vmem_to_smem %s20_s16, 16, %s357_s1, [#allocation2] }
  0x1e   :  { %341 = dma.done.wait [#allocation2], 48 }
  0x1f   :  { %342 = vsyncadd [#allocation2], 4294967248 }
  0x20   :  { %24 = sfence }
  0x21   :  { %25 = vsyncpa [#allocation7], 0 }
  0x22   :  { %26 = vsyncpa [#allocation10], 0 }
  0x23   :  { %27 = vsyncpa [#allocation8], 0 }
  0x24   :  { %28 = vsyncpa [#allocation13], 0  ;;  %s358_s2 = smov [#allocation6]   ;;  %s227_s22 = scalar_lea.hbm %s520_s3, 1024 }
  0x25   :  { %s34_s19 = sshll.u32 %s358_s2, 4  ;;  %p228_p13 = scmp.ne.s32.totalorder %s520_s3, %s227_s22  ;;  %s35_s19 = int_to_ptr.vmem [resolvable:$true] %s34_s19 }
  0x26   :  { %p231_p0 = scmp.lt.u32.totalorder %s227_s22, %s520_s3 }
  0x28   :  { %p233_p1 = pnand %p231_p0, %p228_p13 }
  0x2a   :  { %236 = shalt.err (!%p233_p1)
}
  0x2b   :  { %s237_s27 = scalar_lea.vmem %s35_s19, 1024  ;;  %p242_p3 = scmp.lt.s32.totalorder %s35_s19, %s35_s19 }
  0x2c   :  { %p238_p2 = scmp.ne.s32.totalorder %s35_s19, %s237_s27  ;;  %p243_p4 = scmp.lt.s32.totalorder %s237_s27, %s237_s27 }
  0x2e   :  { %p244_p5 = por %p243_p4, %p242_p3 }
  0x30   :  { %p245_p6 = pnand %p244_p5, %p238_p2 }
  0x32   :  { %248 = shalt.err (!%p245_p6)
}
  0x33   :  { %s359_s28 = smov 128   ;;  %s360_s29 = smov 8  }
  0x34   :  { %40 = dma.hbm_to_vmem [thread:$0]  %s520_s3, 1024, %s35_s19, [#allocation7], %s359_s28, %s359_s28, %s360_s29  }
  0x35   :  { %s361_s9 = smov [#allocation9]   ;;  %s249_s13 = scalar_lea.hbm %s521_s4, 256 }
  0x36   :  { %s46_s10 = sshll.u32 %s361_s9, 4  ;;  %p250_p7 = scmp.ne.s32.totalorder %s521_s4, %s249_s13  ;;  %s47_s10 = int_to_ptr.vmem [resolvable:$true] %s46_s10 }
  0x37   :  { %p253_p8 = scmp.lt.u32.totalorder %s249_s13, %s521_s4 }
  0x39   :  { %p255_p9 = pnand %p253_p8, %p250_p7 }
  0x3b   :  { %258 = shalt.err (!%p255_p9)
}
  0x3c   :  { %s259_s18 = scalar_lea.vmem %s47_s10, 256  ;;  %p264_p11 = scmp.lt.s32.totalorder %s47_s10, %s47_s10 }
  0x3d   :  { %p260_p10 = scmp.ne.s32.totalorder %s47_s10, %s259_s18  ;;  %p265_p12 = scmp.lt.s32.totalorder %s259_s18, %s259_s18 }
  0x3f   :  { %p266_p13 = por %p265_p12, %p264_p11 }
  0x41   :  { %p267_p0 = pnand %p266_p13, %p260_p10 }
  0x43   :  { %270 = shalt.err (!%p267_p0)
}
  0x44   :  { %52 = dma.hbm_to_vmem [thread:$0]  %s521_s4, 256, %s47_s10, [#allocation10], %s359_s28, %s359_s28, %s360_s29  }
  0x45   :  { %343 = dma.done.wait [#allocation7], 1024  }
  0x46   :  { %344 = vsyncadd [#allocation7], 4294966272 }
  0x47   :  { %345 = dma.done.wait [#allocation10], 256  }
  0x48   :  { %346 = vsyncadd [#allocation10], 4294967040  ;;  %s453_s1 = smov 0  }
  0x49 LB: > { %s67_s2 = sld [smem:[#allocation3 + %s353_s1]]  ;;  %s84_s21 = scalar_lea.vmem [#allocation11], %s353_s1  ;;  %s353_s1 = sphi %s453_s1, %s65_s1  }
  0x4a   : > { %s72_s19 = sld [smem:[#allocation4 + %s353_s1]]  ;;  %s88_s23 = scalar_lea.vmem [#allocation12], %s353_s1 }
  0x4b   : > { %s77_s20 = sld [smem:[#allocation5 + %s353_s1]]  ;;  %s92_s25 = scalar_lea.vmem [#allocation14], %s353_s1 }
  0x4c   : > { %s65_s1 = sadd.s32 1, %s353_s1  }
  0x4d   : > { %p62_p7 = scmp.ge.s32.totalorder %s65_s1, 32  }
  0x4e   :  { %s362_s26 = smov (%p62_p7), [#allocation12]   ;;  %s363_s30 = smov (%p62_p7), [#allocation11]  }
  0x4f   : > { %p68_p1 = scmp.gt.s32.totalorder %s67_s2, 0  ;;  %p154_p2 = scmp.lt.s32.totalorder %s67_s2, 63 }
  0x50   : > { %p73_p3 = scmp.gt.s32.totalorder %s72_s19, 0  ;;  %p159_p4 = scmp.lt.s32.totalorder %s72_s19, 15 }
  0x51   : > { %s528_s2 = smov (!%p68_p1, %s67_s2), 0  ;;  %p78_p5 = scmp.gt.s32.totalorder %s77_s20, 0 }
  0x52   : > { %s530_s19 = smov (!%p73_p3, %s72_s19), 0  ;;  %s532_s2 = smov (!%p154_p2, %s528_s2), 63 }
  0x53   : > { %s534_s19 = smov (!%p159_p4, %s530_s19), 15  ;;  %s82_s4 = scalar_lea.vmem [#allocation6], %s532_s2 }
  0x54   : > { %v83_v0 = vld [vmem:[%s82_s4] sm:$0x1]  ;;  %p164_p6 = scmp.lt.s32.totalorder %s77_s20, 63  ;;  %s86_s22 = scalar_lea.vmem [#allocation9], %s534_s19 }
  0x55   : > { %85 = vst [vmem:[%s84_s21] sm:$0x1] %v83_v0  ;;  %v87_v1 = vld [vmem:[%s86_s22] sm:$0x1]  ;;  %s536_s20 = smov (!%p78_p5, %s77_s20), 0  ;;  %64 = sbr.rel (!%p62_p7) target bundleno = 73 (0x49), region = 65 }
  0x56   : > { %89 = vst [vmem:[%s88_s23] sm:$0x1] %v87_v1  ;;  %s538_s20 = smov (!%p164_p6, %s536_s20), 63  ;;  %s111_s27 = sshll.u32 (%p62_p7), %s362_s26, 4  ;;  %s112_s27 = int_to_ptr.vmem [resolvable:$true] %s111_s27 }
  0x57   : > { %s90_s24 = scalar_lea.vmem [#allocation6], %s538_s20  ;;  %s99_s8 = sshll.u32 (%p62_p7), %s363_s30, 4  ;;  %s467_s8 = int_to_ptr.vmem [resolvable:$true] %s99_s8 }
  0x58   : > { %v91_v2 = vld [vmem:[%s90_s24] sm:$0x1]  ;;  %s271_s9 = scalar_lea.vmem (%p62_p7), %s112_s27, 512  ;;  %p276_p9 = scmp.lt.s32.totalorder (%p62_p7), %s112_s27, %s112_s27 }
  0x59   : > { %93 = vst [vmem:[%s92_s25] sm:$0x1] %v91_v2  ;;  %p272_p8 = scmp.ne.s32.totalorder (%p62_p7), %s112_s27, %s271_s9  ;;  %p277_p10 = scmp.lt.s32.totalorder (%p62_p7), %s271_s9, %s271_s9 }
  0x5b   :  { %p278_p11 = por (%p62_p7), %p277_p10, %p276_p9 }
  0x5d   :  { %p279_p12 = pnand %p278_p11, %p272_p8 }
  0x5f   :  { %282 = shalt.err (!%p279_p12)
}
  0x60   :  { %s283_s12 = scalar_lea.hbm %s523_s6, 512 }
  0x61   :  { %p284_p13 = scmp.ne.s32.totalorder %s523_s6, %s283_s12  ;;  %p287_p0 = scmp.lt.u32.totalorder %s283_s12, %s523_s6 }
  0x63   :  { %p289_p1 = pnand %p287_p0, %p284_p13 }
  0x65   :  { %292 = shalt.err (!%p289_p1)
}
  0x66   :  { %117 = dma.vmem_to_hbm [thread:$0]  %s112_s27, 512, %s523_s6, [#allocation13], %s359_s28, %s359_s28, %s360_s29  }
  0x67   :  { %s293_s3 = scalar_lea.vmem %s467_s8, 512  ;;  %p298_p3 = scmp.lt.s32.totalorder %s467_s8, %s467_s8 }
  0x68   :  { %p294_p2 = scmp.ne.s32.totalorder %s467_s8, %s293_s3  ;;  %p299_p4 = scmp.lt.s32.totalorder %s293_s3, %s293_s3 }
  0x6a   :  { %p300_p5 = por %p299_p4, %p298_p3 }
  0x6c   :  { %p301_p6 = pnand %p300_p5, %p294_p2 }
  0x6e   :  { %304 = shalt.err (!%p301_p6)
}
  0x6f   :  { %s305_s2 = scalar_lea.hbm %s522_s5, 512 }
  0x70   :  { %p306_p7 = scmp.ne.s32.totalorder %s522_s5, %s305_s2  ;;  %p309_p8 = scmp.lt.u32.totalorder %s305_s2, %s522_s5 }
  0x72   :  { %p311_p9 = pnand %p309_p8, %p306_p7 }
  0x74   :  { %314 = shalt.err (!%p311_p9)
}
  0x75   :  { %105 = dma.vmem_to_hbm [thread:$0]  %s467_s8, 512, %s522_s5, [#allocation8], %s359_s28, %s359_s28, %s360_s29  }
  0x76   :  { %s364_s23 = smov [#allocation14]  }
  0x77   :  { %s123_s24 = sshll.u32 %s364_s23, 4  ;;  %s124_s24 = int_to_ptr.vmem [resolvable:$true] %s123_s24 }
  0x78   :  { %s315_s25 = scalar_lea.vmem %s124_s24, 512  ;;  %p320_p11 = scmp.lt.s32.totalorder %s124_s24, %s124_s24 }
  0x79   :  { %p316_p10 = scmp.ne.s32.totalorder %s124_s24, %s315_s25  ;;  %p321_p12 = scmp.lt.s32.totalorder %s315_s25, %s315_s25 }
  0x7b   :  { %p322_p13 = por %p321_p12, %p320_p11 }
  0x7d   :  { %p323_p0 = pnand %p322_p13, %p316_p10 }
  0x7f   :  { %326 = shalt.err (!%p323_p0)
}
  0x80   :  { %s327_s30 = scalar_lea.hbm %s524_s7, 512 }
  0x81   :  { %p328_p1 = scmp.ne.s32.totalorder %s524_s7, %s327_s30  ;;  %p331_p2 = scmp.lt.u32.totalorder %s327_s30, %s524_s7 }
  0x83   :  { %p333_p3 = pnand %p331_p2, %p328_p1 }
  0x85   :  { %336 = shalt.err (!%p333_p3)
}
  0x86   :  { %129 = dma.vmem_to_hbm [thread:$0]  %s124_s24, 512, %s524_s7, [#allocation13], %s359_s28, %s359_s28, %s360_s29  }
  0x87   :  { %347 = dma.done.wait [#allocation8], 512  }
  0x88   :  { %348 = vsyncadd [#allocation8], 4294966784 }
  0x89   :  { %349 = dma.done.wait [#allocation13], 1024  }
  0x8a   :  { %350 = vsyncadd [#allocation13], 4294966272 }
  0x8b   :  { %139 = vsyncpa [#allocation7], 1 }
  0x8c   :  { %140 = vsyncpa [#allocation10], 1 }
  0x8d   :  { %141 = vsyncpa [#allocation8], 1 }
  0x8e   :  { %142 = vsyncpa [#allocation13], 1 }

</bundles_post_ra>
